<compile_context>
chip_gen: v6e
topology: v6e:2x2x1
jax: 0.10.0
libtpu: 0.0.40
codegen_flags: <defaults>
</compile_context>

<pallas_src>
import functools

import jax
import jax.numpy as jnp
import numpy as np
from jax.experimental import pallas as pl
from jax.experimental.pallas import tpu as pltpu


def _round_up(x, m):
    return ((x + m - 1) // m) * m


def self_attention_kernel(q_ref, k_ref, kbias_ref, wc_ref, wq_ref, ds_ref,
                          w1_ref, w2_ref, w3_ref, bout_ref, o_ref,
                          *, mxu_dtype, approx_recip):
    cq = q_ref[0]            # (TQ, D2p)  query rows of the context (f32)
    ck = k_ref[0]            # (Lp, D2p)  full context = keys/values (mxu dtype)
    kbias = kbias_ref[0]     # (1, Lp)    additive padding bias: 0 valid, -1e30 pad

    wc = wc_ref[...]         # (1, D2p)
    wq = wq_ref[...]         # (1, D2p)
    ds = ds_ref[...]         # (1, D2p)

    # Trilinear scores. Key-side bias (w_q . c_j) is folded into the MXU
    # operand; query-side bias (w_c . c_i) is a cheap VPU lane reduction.
    # dot_general contracts dim 1 of both operands (A @ B^T) -> no XLU
    # transpose of the key tile.
    lhs = (cq * ds + wq).astype(mxu_dtype)                          # (TQ, D2p)
    s = jax.lax.dot_general(
        lhs, ck, dimension_numbers=(((1,), (1,)), ((), ())),
        preferred_element_type=jnp.float32)                         # (TQ, Lp)
    s = s + jnp.sum(cq * wc, axis=-1, keepdims=True)                # (TQ, 1) bcast
    s = s + kbias                                                   # padded keys

    # Diagonal mask: a token never attends to itself.
    n_q, n_k = s.shape
    q0 = pl.program_id(1) * n_q
    rows = jax.lax.broadcasted_iota(jnp.int32, (n_q, n_k), 0) + q0
    cols = jax.lax.broadcasted_iota(jnp.int32, (n_q, n_k), 1)
    s = jnp.where(rows == cols, jnp.float32(-1e30), s)

    # Softmax over keys with deferred normalization.
    m = jnp.max(s, axis=-1, keepdims=True)
    p = jnp.exp(s - m)
    denom = jnp.sum(p, axis=-1, keepdims=True)

    c2q = jnp.dot(p.astype(mxu_dtype), ck,
                  preferred_element_type=jnp.float32)               # (TQ, D2p)
    c2q = c2q * pl.reciprocal(denom, approx=approx_recip)

    # Output projection as three accumulating MXU dots (no feature concat):
    #   relu(cq @ W1 + c2q @ W2 + (cq*c2q) @ W3 + b)
    out = jnp.dot(cq.astype(mxu_dtype), w1_ref[...],
                  preferred_element_type=jnp.float32)
    out = out + jnp.dot(c2q.astype(mxu_dtype), w2_ref[...],
                        preferred_element_type=jnp.float32)
    out = out + jnp.dot((cq * c2q).astype(mxu_dtype), w3_ref[...],
                        preferred_element_type=jnp.float32)
    out = out + bout_ref[...]
    o_ref[0] = jnp.maximum(out, 0.0).astype(o_ref.dtype)


def self_attention_forward(context, context_mask, params, *, tq=256, precise=False):
    B, L, D2 = context.shape
    linear_dim = params["b_out"].shape[-1]
    mxu_dtype = jnp.float32 if precise else jnp.bfloat16
    mxu_bytes = np.dtype(mxu_dtype).itemsize

    # Lane-dense padding: feature / output dims to multiples of 128, sequence to
    # a multiple of the query tile. Padded keys are masked out, padded query
    # rows and output lanes are sliced off below.
    D2p = _round_up(D2, 128)
    Np = _round_up(linear_dim, 128)
    TQ = min(tq, _round_up(L, 8))

    # VMEM-aware tile sizing: double-buffered I/O + resident weights + rough
    # allowance for the (TQ, Lp) score/exp intermediates. Keeps v7x (64 MiB/TC)
    # from OOMing while letting v5e/v6e (128 MiB) use bigger tiles.
    def _footprint(tq_):
        lp_ = _round_up(L, tq_)
        keys = 2 * lp_ * D2p * mxu_bytes                       # double-buffered keys
        io = 2 * (tq_ * D2p * 4 + tq_ * Np * 4 + lp_ * 4)      # query tile, out tile, bias
        weights = 3 * D2p * Np * mxu_bytes + (Np + 4 * D2p) * 4
        interm = 4 * tq_ * lp_ * 4 + 4 * tq_ * D2p * 4         # scores/exp + c2q/feat temps
        return keys + io + weights + interm

    try:
        vmem_cap = int(pltpu.get_tpu_info().vmem_capacity_bytes)
    except Exception:
        vmem_cap = 64 * 1024 * 1024
    budget = int(vmem_cap * 0.7)
    while TQ > 128 and _footprint(TQ) > budget:
        TQ = max(128, _round_up(TQ // 2, 8))
    Lp = _round_up(L, TQ)
    vmem_limit = int(min(max(int(_footprint(TQ) * 1.25), 32 * 1024 * 1024), budget))

    # Query context stays f32 (bias math precision); keys/values are DMA'd at
    # MXU precision (bf16 on the fast path -> halves the dominant buffer).
    ctx_f32 = jnp.zeros((B, Lp, D2p), jnp.float32).at[:, :L, :D2].set(
        context.astype(jnp.float32))
    ctx_k = ctx_f32 if precise else ctx_f32.astype(jnp.bfloat16)

    # Additive padding bias precomputed on host: 0 for valid keys, -1e30 for
    # padded (both real padding inside [0, L) and the Lp tail).
    kbias = jnp.full((B, 1, Lp), -1e30, jnp.float32).at[:, 0, :L].set(
        (context_mask.astype(jnp.float32) - 1.0) * 1e30)

    def pad_vec(v):  # (1, D2) -> (1, D2p)
        return jnp.zeros((1, D2p), jnp.float32).at[:, :D2].set(v.astype(jnp.float32))

    wc = pad_vec(params["w_c"])
    wq = pad_vec(params["w_q"])
    ds = pad_vec(params["dot_scale"])

    def pad_w(w):  # (D2, linear_dim) -> (D2p, Np) in MXU dtype
        return jnp.zeros((D2p, Np), jnp.float32).at[:D2, :linear_dim].set(
            w.astype(jnp.float32)).astype(mxu_dtype)

    w1p, w2p, w3p = pad_w(params["w1"]), pad_w(params["w2"]), pad_w(params["w3"])
    bout = jnp.zeros((1, Np), jnp.float32).at[:, :linear_dim].set(params["b_out"])

    kernel = functools.partial(self_attention_kernel,
                               mxu_dtype=mxu_dtype,
                               approx_recip=not precise)

    out = pl.pallas_call(
        kernel,
        out_shape=jax.ShapeDtypeStruct((B, Lp, Np), jnp.float32),
        grid_spec=pltpu.PrefetchScalarGridSpec(
            num_scalar_prefetch=0,
            grid=(B, Lp // TQ),
            in_specs=[
                pl.BlockSpec((1, TQ, D2p), lambda b, q: (b, q, 0)),   # query tile (f32)
                pl.BlockSpec((1, Lp, D2p), lambda b, q: (b, 0, 0)),   # keys (mxu dtype)
                pl.BlockSpec((1, 1, Lp), lambda b, q: (b, 0, 0)),     # additive key bias
                pl.BlockSpec((1, D2p), lambda b, q: (0, 0)),          # w_c
                pl.BlockSpec((1, D2p), lambda b, q: (0, 0)),          # w_q
                pl.BlockSpec((1, D2p), lambda b, q: (0, 0)),          # dot_scale
                pl.BlockSpec((D2p, Np), lambda b, q: (0, 0)),         # W1
                pl.BlockSpec((D2p, Np), lambda b, q: (0, 0)),         # W2
                pl.BlockSpec((D2p, Np), lambda b, q: (0, 0)),         # W3
                pl.BlockSpec((1, Np), lambda b, q: (0, 0)),           # b_out
            ],
            out_specs=pl.BlockSpec((1, TQ, Np), lambda b, q: (b, q, 0)),
        ),
        compiler_params=pltpu.CompilerParams(
            dimension_semantics=("parallel", "parallel"),
            vmem_limit_bytes=vmem_limit,
        ),
    )(ctx_f32, ctx_k, kbias, wc, wq, ds, w1p, w2p, w3p, bout)

    return out[:, :L, :linear_dim]


def reference_forward(context, context_mask, params):
    """Pure-JAX f32 reference of the same forward pass."""
    B, L, D2 = context.shape
    wc = params["w_c"][0]
    wq = params["w_q"][0]
    ds = params["dot_scale"][0]
    s = (jnp.einsum("bid,bjd->bij", context * ds, context)
         + jnp.einsum("bid,d->bi", context, wc)[:, :, None]
         + jnp.einsum("bjd,d->bj", context, wq)[:, None, :])
    eye = jnp.eye(L, dtype=bool)[None]
    valid = (context_mask[:, None, :] > 0) & (~eye)
    s = jnp.where(valid, s, -1e30)
    attn = jax.nn.softmax(s, axis=-1)
    c2q = jnp.einsum("bij,bjd->bid", attn, context)
    feat = jnp.concatenate([context, c2q, context * c2q], axis=-1)
    W = jnp.concatenate([params["w1"], params["w2"], params["w3"]], axis=0)
    return jax.nn.relu(feat @ W + params["b_out"][0])


def init_params(key, rnn_dim, linear_dim):
    D2 = 2 * rnn_dim
    ks = jax.random.split(key, 6)
    scale = 1.0 / np.sqrt(D2)
    return {
        # trilinear attention parameters (DocQAAttention)
        "w_c": jax.random.uniform(ks[0], (1, D2), jnp.float32, -scale, scale),
        "w_q": jax.random.uniform(ks[1], (1, D2), jnp.float32, -scale, scale),
        "dot_scale": jax.random.uniform(ks[2], (1, D2), jnp.float32, 0.0, scale),
        # self_attn_Linear(rnn_dim*6 -> linear_dim), weight split into 3 blocks of D2 rows
        "w1": jax.random.normal(ks[3], (D2, linear_dim), jnp.float32) * 0.05,
        "w2": jax.random.normal(ks[4], (D2, linear_dim), jnp.float32) * 0.05,
        "w3": jax.random.normal(ks[5], (D2, linear_dim), jnp.float32) * 0.05,
        "b_out": jnp.zeros((1, linear_dim), jnp.float32),
    }


if __name__ == "__main__":
    rnn_dim, linear_dim = 16, 32          # context feature dim = 2*rnn_dim = 32
    B, L = 2, 8

    key = jax.random.PRNGKey(0)
    k_ctx, k_par = jax.random.split(key)
    context = jax.random.normal(k_ctx, (B, L, 2 * rnn_dim), jnp.float32)
    # batch 0 fully valid, batch 1 has last two positions padded
    context_mask = jnp.array(
        [[1] * L, [1] * (L - 2) + [0, 0]], dtype=jnp.float32
    )
    params = init_params(k_par, rnn_dim, linear_dim)

    ref = reference_forward(context, context_mask, params)

    # Exact-semantics path (f32 MXU operands, exact reciprocal): tight tolerance.
    out_f32 = jax.block_until_ready(
        self_attention_forward(context, context_mask, params, precise=True))
    np.testing.assert_allclose(np.asarray(out_f32), np.asarray(ref),
                               atol=1e-4, rtol=1e-4)

    # Fast path (bf16 keys/weights on the MXU + approx EUP reciprocal): loose tolerance.
    out_bf16 = jax.block_until_ready(
        self_attention_forward(context, context_mask, params, precise=False))
    np.testing.assert_allclose(np.asarray(out_bf16), np.asarray(ref),
                               atol=5e-2, rtol=5e-2)

    print("KERNEL_OK")
</pallas_src>

<mosaic_0001>
module attributes {stable_mosaic.version = 11 : i64} {
  func.func @self_attention_kernel(%arg0: i32, %arg1: i32, %arg2: memref<1x8x128xf32, #tpu.memory_space<vmem>>, %arg3: memref<1x8x128xf32, #tpu.memory_space<vmem>>, %arg4: memref<1x1x8xf32, #tpu.memory_space<vmem>>, %arg5: memref<1x128xf32, #tpu.memory_space<vmem>>, %arg6: memref<1x128xf32, #tpu.memory_space<vmem>>, %arg7: memref<1x128xf32, #tpu.memory_space<vmem>>, %arg8: memref<128x128xf32, #tpu.memory_space<vmem>>, %arg9: memref<128x128xf32, #tpu.memory_space<vmem>>, %arg10: memref<128x128xf32, #tpu.memory_space<vmem>>, %arg11: memref<1x128xf32, #tpu.memory_space<vmem>>, %arg12: memref<1x8x128xf32, #tpu.memory_space<vmem>>) attributes {dimension_semantics = [#tpu.dimension_semantics<parallel>, #tpu.dimension_semantics<parallel>], iteration_bounds = array<i64: 2, 1>, scalar_prefetch = 0 : i64, scratch_operands = 0 : i64, tpu.core_type = #tpu.core_type<tc>, window_params = [{transform_indices = @transform_0, window_bounds = array<i64: 1, 8, 128>}, {transform_indices = @transform_1, window_bounds = array<i64: 1, 8, 128>}, {transform_indices = @transform_2, window_bounds = array<i64: 1, 1, 8>}, {pipeline_mode = #tpu.pipeline_mode<synchronous>, transform_indices = @transform_3, window_bounds = array<i64: 1, 128>}, {pipeline_mode = #tpu.pipeline_mode<synchronous>, transform_indices = @transform_4, window_bounds = array<i64: 1, 128>}, {pipeline_mode = #tpu.pipeline_mode<synchronous>, transform_indices = @transform_5, window_bounds = array<i64: 1, 128>}, {pipeline_mode = #tpu.pipeline_mode<synchronous>, transform_indices = @transform_6, window_bounds = array<i64: 128, 128>}, {pipeline_mode = #tpu.pipeline_mode<synchronous>, transform_indices = @transform_7, window_bounds = array<i64: 128, 128>}, {pipeline_mode = #tpu.pipeline_mode<synchronous>, transform_indices = @transform_8, window_bounds = array<i64: 128, 128>}, {pipeline_mode = #tpu.pipeline_mode<synchronous>, transform_indices = @transform_9, window_bounds = array<i64: 1, 128>}, {transform_indices = @transform_10, window_bounds = array<i64: 1, 8, 128>}]} {
    %c0 = arith.constant 0 : index
    %c0_0 = arith.constant 0 : index
    %c0_1 = arith.constant 0 : index
    %0 = vector.load %arg2[%c0, %c0_0, %c0_1] : memref<1x8x128xf32, #tpu.memory_space<vmem>>, vector<1x8x128xf32>
    %1 = vector.shape_cast %0 : vector<1x8x128xf32> to vector<8x128xf32>
    %c0_2 = arith.constant 0 : index
    %c0_3 = arith.constant 0 : index
    %c0_4 = arith.constant 0 : index
    %2 = vector.load %arg3[%c0_2, %c0_3, %c0_4] : memref<1x8x128xf32, #tpu.memory_space<vmem>>, vector<1x8x128xf32>
    %3 = vector.shape_cast %2 : vector<1x8x128xf32> to vector<8x128xf32>
    %c0_5 = arith.constant 0 : index
    %c0_6 = arith.constant 0 : index
    %c0_7 = arith.constant 0 : index
    %4 = vector.load %arg4[%c0_5, %c0_6, %c0_7] : memref<1x1x8xf32, #tpu.memory_space<vmem>>, vector<1x1x8xf32>
    %5 = vector.shape_cast %4 : vector<1x1x8xf32> to vector<1x8xf32>
    %c0_8 = arith.constant 0 : index
    %c0_9 = arith.constant 0 : index
    %6 = vector.load %arg5[%c0_8, %c0_9] : memref<1x128xf32, #tpu.memory_space<vmem>>, vector<1x128xf32>
    %c0_10 = arith.constant 0 : index
    %c0_11 = arith.constant 0 : index
    %7 = vector.load %arg6[%c0_10, %c0_11] : memref<1x128xf32, #tpu.memory_space<vmem>>, vector<1x128xf32>
    %c0_12 = arith.constant 0 : index
    %c0_13 = arith.constant 0 : index
    %8 = vector.load %arg7[%c0_12, %c0_13] : memref<1x128xf32, #tpu.memory_space<vmem>>, vector<1x128xf32>
    %9 = vector.broadcast %8 : vector<1x128xf32> to vector<8x128xf32>
    %10 = arith.mulf %1, %9 : vector<8x128xf32>
    %11 = vector.broadcast %7 : vector<1x128xf32> to vector<8x128xf32>
    %12 = arith.addf %10, %11 : vector<8x128xf32>
    %cst = arith.constant dense<0.000000e+00> : vector<8x8xf32>
    %13 = tpu.matmul %12, %3, %cst {dimension_numbers = #tpu.dot_dimension_numbers<[1], [1], [0], [0], [0, 0, 1, 0], [], []>} : vector<8x128xf32>, vector<8x128xf32>, vector<8x8xf32> -> vector<8x8xf32>
    %14 = vector.broadcast %6 : vector<1x128xf32> to vector<8x128xf32>
    %15 = arith.mulf %1, %14 : vector<8x128xf32>
    %cst_14 = arith.constant dense<0.000000e+00> : vector<8xf32>
    %16 = vector.multi_reduction <add>, %15, %cst_14 [1] : vector<8x128xf32> to vector<8xf32>
    %17 = vector.shape_cast %16 : vector<8xf32> to vector<8x1xf32>
    %18 = vector.broadcast %17 : vector<8x1xf32> to vector<8x8xf32>
    %19 = arith.addf %13, %18 : vector<8x8xf32>
    %20 = vector.broadcast %5 : vector<1x8xf32> to vector<8x8xf32>
    %21 = arith.addf %19, %20 : vector<8x8xf32>
    %c8_i32 = arith.constant 8 : i32
    %22 = arith.muli %arg1, %c8_i32 : i32
    %23 = tpu.iota {dimensions = array<i32: 0>} : vector<8x8xi32>
    %24 = vector.broadcast %22 : i32 to vector<8x8xi32>
    %25 = arith.addi %23, %24 : vector<8x8xi32>
    %26 = tpu.iota {dimensions = array<i32: 1>} : vector<8x8xi32>
    %27 = arith.cmpi eq, %25, %26 : vector<8x8xi32>
    %cst_15 = arith.constant -1.000000e+30 : f32
    %28 = vector.broadcast %cst_15 : f32 to vector<8x8xf32>
    %29 = arith.select %27, %28, %21 : vector<8x8xi1>, vector<8x8xf32>
    %cst_16 = arith.constant dense<0xFF800000> : vector<8xf32>
    %30 = vector.multi_reduction <maximumf>, %29, %cst_16 [1] : vector<8x8xf32> to vector<8xf32>
    %31 = vector.shape_cast %30 : vector<8xf32> to vector<8x1xf32>
    %32 = vector.broadcast %31 : vector<8x1xf32> to vector<8x8xf32>
    %33 = arith.subf %29, %32 : vector<8x8xf32>
    %34 = math.exp %33 : vector<8x8xf32>
    %cst_17 = arith.constant dense<0.000000e+00> : vector<8xf32>
    %35 = vector.multi_reduction <add>, %34, %cst_17 [1] : vector<8x8xf32> to vector<8xf32>
    %36 = vector.shape_cast %35 : vector<8xf32> to vector<8x1xf32>
    %cst_18 = arith.constant dense<0.000000e+00> : vector<8x128xf32>
    %37 = tpu.matmul %34, %3, %cst_18 {dimension_numbers = #tpu.dot_dimension_numbers<[1], [0], [0], [1], [0, 0, 1, 1], [], []>} : vector<8x8xf32>, vector<8x128xf32>, vector<8x128xf32> -> vector<8x128xf32>
    %38 = tpu.reciprocal %36 : vector<8x1xf32> -> vector<8x1xf32>
    %39 = vector.broadcast %38 : vector<8x1xf32> to vector<8x128xf32>
    %40 = arith.mulf %37, %39 : vector<8x128xf32>
    %c0_19 = arith.constant 0 : index
    %c0_20 = arith.constant 0 : index
    %41 = vector.load %arg8[%c0_19, %c0_20] : memref<128x128xf32, #tpu.memory_space<vmem>>, vector<128x128xf32>
    %cst_21 = arith.constant dense<0.000000e+00> : vector<8x128xf32>
    %42 = tpu.matmul %1, %41, %cst_21 {dimension_numbers = #tpu.dot_dimension_numbers<[1], [0], [0], [1], [0, 0, 1, 1], [], []>} : vector<8x128xf32>, vector<128x128xf32>, vector<8x128xf32> -> vector<8x128xf32>
    %c0_22 = arith.constant 0 : index
    %c0_23 = arith.constant 0 : index
    %43 = vector.load %arg9[%c0_22, %c0_23] : memref<128x128xf32, #tpu.memory_space<vmem>>, vector<128x128xf32>
    %cst_24 = arith.constant dense<0.000000e+00> : vector<8x128xf32>
    %44 = tpu.matmul %40, %43, %cst_24 {dimension_numbers = #tpu.dot_dimension_numbers<[1], [0], [0], [1], [0, 0, 1, 1], [], []>} : vector<8x128xf32>, vector<128x128xf32>, vector<8x128xf32> -> vector<8x128xf32>
    %45 = arith.addf %42, %44 : vector<8x128xf32>
    %46 = arith.mulf %1, %40 : vector<8x128xf32>
    %c0_25 = arith.constant 0 : index
    %c0_26 = arith.constant 0 : index
    %47 = vector.load %arg10[%c0_25, %c0_26] : memref<128x128xf32, #tpu.memory_space<vmem>>, vector<128x128xf32>
    %cst_27 = arith.constant dense<0.000000e+00> : vector<8x128xf32>
    %48 = tpu.matmul %46, %47, %cst_27 {dimension_numbers = #tpu.dot_dimension_numbers<[1], [0], [0], [1], [0, 0, 1, 1], [], []>} : vector<8x128xf32>, vector<128x128xf32>, vector<8x128xf32> -> vector<8x128xf32>
    %49 = arith.addf %45, %48 : vector<8x128xf32>
    %c0_28 = arith.constant 0 : index
    %c0_29 = arith.constant 0 : index
    %50 = vector.load %arg11[%c0_28, %c0_29] : memref<1x128xf32, #tpu.memory_space<vmem>>, vector<1x128xf32>
    %51 = vector.broadcast %50 : vector<1x128xf32> to vector<8x128xf32>
    %52 = arith.addf %49, %51 : vector<8x128xf32>
    %cst_30 = arith.constant 0.000000e+00 : f32
    %53 = vector.broadcast %cst_30 : f32 to vector<8x128xf32>
    %54 = arith.maximumf %52, %53 : vector<8x128xf32>
    %c0_31 = arith.constant 0 : index
    %c0_32 = arith.constant 0 : index
    %c0_33 = arith.constant 0 : index
    %55 = vector.load %arg12[%c0_31, %c0_32, %c0_33] : memref<1x8x128xf32, #tpu.memory_space<vmem>>, vector<1x8x128xf32>
    %56 = vector.shape_cast %55 : vector<1x8x128xf32> to vector<8x128xf32>
    %57 = vector.shape_cast %54 : vector<8x128xf32> to vector<1x8x128xf32>
    tpu.vector_store %arg12[%c0_31, %c0_32, %c0_33], %57 {strides = array<i32>} : memref<1x8x128xf32, #tpu.memory_space<vmem>>, vector<1x8x128xf32>,
    return
  }
  func.func @transform_0(%arg0: i32, %arg1: i32) -> (i32, i32, i32) {
    %c0_i32 = arith.constant 0 : i32
    %c0_i32_0 = arith.constant 0 : i32
    return %arg0, %arg1, %c0_i32 : i32, i32, i32
  }
  func.func @transform_1(%arg0: i32, %arg1: i32) -> (i32, i32, i32) {
    %c0_i32 = arith.constant 0 : i32
    %c0_i32_0 = arith.constant 0 : i32
    %c0_i32_1 = arith.constant 0 : i32
    return %arg0, %c0_i32, %c0_i32_0 : i32, i32, i32
  }
  func.func @transform_2(%arg0: i32, %arg1: i32) -> (i32, i32, i32) {
    %c0_i32 = arith.constant 0 : i32
    %c0_i32_0 = arith.constant 0 : i32
    %c0_i32_1 = arith.constant 0 : i32
    return %arg0, %c0_i32, %c0_i32_0 : i32, i32, i32
  }
  func.func @transform_3(%arg0: i32, %arg1: i32) -> (i32, i32) {
    %c0_i32 = arith.constant 0 : i32
    %c0_i32_0 = arith.constant 0 : i32
    %c0_i32_1 = arith.constant 0 : i32
    return %c0_i32, %c0_i32_0 : i32, i32
  }
  func.func @transform_4(%arg0: i32, %arg1: i32) -> (i32, i32) {
    %c0_i32 = arith.constant 0 : i32
    %c0_i32_0 = arith.constant 0 : i32
    %c0_i32_1 = arith.constant 0 : i32
    return %c0_i32, %c0_i32_0 : i32, i32
  }
  func.func @transform_5(%arg0: i32, %arg1: i32) -> (i32, i32) {
    %c0_i32 = arith.constant 0 : i32
    %c0_i32_0 = arith.constant 0 : i32
    %c0_i32_1 = arith.constant 0 : i32
    return %c0_i32, %c0_i32_0 : i32, i32
  }
  func.func @transform_6(%arg0: i32, %arg1: i32) -> (i32, i32) {
    %c0_i32 = arith.constant 0 : i32
    %c0_i32_0 = arith.constant 0 : i32
    %c0_i32_1 = arith.constant 0 : i32
    return %c0_i32, %c0_i32_0 : i32, i32
  }
  func.func @transform_7(%arg0: i32, %arg1: i32) -> (i32, i32) {
    %c0_i32 = arith.constant 0 : i32
    %c0_i32_0 = arith.constant 0 : i32
    %c0_i32_1 = arith.constant 0 : i32
    return %c0_i32, %c0_i32_0 : i32, i32
  }
  func.func @transform_8(%arg0: i32, %arg1: i32) -> (i32, i32) {
    %c0_i32 = arith.constant 0 : i32
    %c0_i32_0 = arith.constant 0 : i32
    %c0_i32_1 = arith.constant 0 : i32
    return %c0_i32, %c0_i32_0 : i32, i32
  }
  func.func @transform_9(%arg0: i32, %arg1: i32) -> (i32, i32) {
    %c0_i32 = arith.constant 0 : i32
    %c0_i32_0 = arith.constant 0 : i32
    %c0_i32_1 = arith.constant 0 : i32
    return %c0_i32, %c0_i32_0 : i32, i32
  }
  func.func @transform_10(%arg0: i32, %arg1: i32) -> (i32, i32, i32) {
    %c0_i32 = arith.constant 0 : i32
    %c0_i32_0 = arith.constant 0 : i32
    return %arg0, %arg1, %c0_i32 : i32, i32, i32
  }
}

</mosaic_0001>

<bundles_post_ra>
// kernel: tpu_custom_call.1
= control target key start
LH: loop header
LB: loop body
LE: loop exit
PB: predicated region body
PF: predicated region fallthrough
CT: control target
= control target key end

     0   :  { %s1998_s0 = inlined_call_operand.hbm [shape: f32[2,8,128], index: 0, kind: input, shape index: {}]   ;;  %s1999_s1 = inlined_call_operand.hbm [shape: f32[2,8,128], index: 1, kind: input, shape index: {}]   ;;  %s2000_s2 = inlined_call_operand.vmem [shape: f32[2,1,8], index: 2, kind: input, shape index: {}]   ;;  %s2001_s3 = inlined_call_operand.vmem [shape: f32[1,128], index: 3, kind: input, shape index: {}]   ;;  %s2002_s4 = inlined_call_operand.vmem [shape: f32[1,128], index: 4, kind: input, shape index: {}]   ;;  %s2003_s5 = inlined_call_operand.vmem [shape: f32[1,128], index: 5, kind: input, shape index: {}]   ;;  %s2004_s6 = inlined_call_operand.hbm [shape: f32[128,128], index: 6, kind: input, shape index: {}]   ;;  %s2005_s7 = inlined_call_operand.hbm [shape: f32[128,128], index: 7, kind: input, shape index: {}]   ;;  %s2006_s8 = inlined_call_operand.hbm [shape: f32[128,128], index: 8, kind: input, shape index: {}]   ;;  %s2007_s9 = inlined_call_operand.vmem [shape: f32[1,128], index: 9, kind: input, shape index: {}]   ;;  %s2008_s10 = inlined_call_operand.hbm [shape: f32[2,8,128], index: 10, kind: output, shape index: {}]  }
   0x1   :  { %2015 = sst [smem:[#allocation20_spill]] %s1998_s0 }
   0x2   :  { %2016 = sst [smem:[#allocation21_spill]] %s2004_s6 }
   0x3   :  { %2017 = sst [smem:[#allocation22_spill]] %s2005_s7 }
   0x4   :  { %2018 = sst [smem:[#allocation23_spill]] %s2006_s8 }
   0x5   :  { %2019 = sst [smem:[#allocation24_spill]] %s2008_s10 }
   0x6   :  { %15 = vsyncpa [#allocation3], 0 }
   0x7   :  { %17 = vsyncpa [#allocation3 + $0x1], 0 }
   0x8   :  { %18 = vsyncpa [#allocation6], 0 }
   0x9   :  { %20 = vsyncpa [#allocation6 + $0x1], 0 }
   0xa   :  { %21 = vsyncpa [#allocation9], 0 }
   0xb   :  { %22 = vsyncpa [#allocation4], 0 }
   0xc   :  { %24 = vsyncpa [#allocation4 + $0x1], 0  ;;  %s1708_s13 = smov 0   ;;  %s1710_s14 = smov 0  }
   0xd   :  { %s1712_s15 = smov 0   ;;  %s1714_s16 = smov 0  }
   0xe   :  { %s1716_s17 = smov 0   ;;  %s1718_s18 = smov 0  }
   0xf LB: > { %2020 = sst [smem:[#allocation17_spill]] %s1621_s13  ;;  %s1739_s19 = sadd.s32 4294967295, %s1641_s18   ;;  %s1641_s18 = sphi %s1718_s18, %s30_s18   ;;  %s1637_s17 = sphi %s1716_s17, %s2049_s17   ;;  %s1633_s16 = sphi %s1714_s16, %s2048_s16   ;;  %s1629_s15 = sphi %s1712_s15, %s2047_s15   ;;  %s1625_s14 = sphi %s1710_s14, %s2046_s14   ;;  %s1621_s13 = sphi %s1708_s13, %s2045_s13  }
  0x10   : > { %s1112_s20 = sadd.s32 4294967294, %s1641_s18   ;;  %p64_p0 = scmp.ne.s32.totalorder %s1625_s14, %s1621_s13 }
  0x11   : > { %p2009_p1 = scmp.eq.s32.totalorder %s1739_s19, 0  ;;  %p295_p3 = scmp.eq.s32.totalorder %s1112_s20, 1 }
  0x12   : > { %p1113_p5 = scmp.ge.s32.totalorder %s1641_s18, 1  ;;  %p302_p7 = scmp.lt.s32.totalorder %s1641_s18, 3 }
  0x13   : > { %p1748_p4 = por %p2009_p1, %p64_p0  ;;  %p1753_p6 = por %p295_p3, %p64_p0 }
  0x14   : > { %p1758_p8 = pnand %p1113_p5, %p302_p7  ;;  %s1643_s24 = smov [#allocation7]  }
  0x15   : > { %s2021_s21 = scalar_select %p1748_p4, 1, 0 }
  0x16   : > { %s2022_s22 = scalar_select %p1753_p6, 1, 0 }
  0x17   : > { %s323_s25 = sshll.u32 %s1643_s24, 4  ;;  %p1327_p9 = pneg %p1758_p8  ;;  %s324_s25 = int_to_ptr.vmem [resolvable:$true] %s323_s25 }
  0x18   : > { %2023 = sst [smem:[#allocation18_spill]] %s2022_s22  ;;  %s1644_s27 = smov [#allocation8]  }
  0x19   : > { %p1767_p11 = pnand %p1327_p9, %p2009_p1  ;;  %s336_s28 = sshll.u32 %s1644_s27, 4  ;;  %s337_s28 = int_to_ptr.vmem [resolvable:$true] %s336_s28 }
  0x1a   : > { %s1645_s29 = smov [#allocation10]   ;;  %s1426_s11 = scalar_lea.vmem %s324_s25, 2048 }
  0x1b   : > { %s349_s30 = sshll.u32 %s1645_s29, 4  ;;  %p1417_p12 = pneg %p1767_p11  ;;  %s350_s30 = int_to_ptr.vmem [resolvable:$true] %s349_s30 }
  0x1c   : > { %p1427_p13 = scmp.ne.s32.totalorder %s324_s25, %s1426_s11  ;;  %p1434_p5 = scmp.lt.s32.totalorder %s324_s25, %s324_s25 }
  0x1d   : > { %p1435_p7 = scmp.lt.s32.totalorder %s1426_s11, %s1426_s11 }
  0x1e   : > { %p1429_p0 = pnand %p1427_p13, %p1417_p12 }
  0x1f   : > { %p1436_p9 = por %p1435_p7, %p1434_p5 }
  0x20   : > { %p1430_p3 = pneg %p1429_p0 }
  0x22   : > { %p1437_p10 = pnand %p1436_p9, %p1430_p3 }
  0x24   : > { %1440 = shalt.err (!%p1437_p10)
}
  0x25   : > { %s1646_s12 = smov 128   ;;  %s1647_s20 = smov 8  }
  0x26   : > { %s2026_s6 = sld [smem:[#allocation21_spill]]  ;;  %s1452_s29 = scalar_lea.vmem %s337_s28, 2048 }
  0x27   : > { %p1453_p1 = scmp.ne.s32.totalorder %s337_s28, %s1452_s29  ;;  %p1460_p2 = scmp.lt.s32.totalorder %s337_s28, %s337_s28 }
  0x28   : > { %p1461_p6 = scmp.lt.s32.totalorder %s1452_s29, %s1452_s29 }
  0x29   : > { %p1455_p13 = pnand %p1453_p1, %p1417_p12 }
  0x2a   : > { %p1462_p5 = por %p1461_p6, %p1460_p2 }
  0x2b   : > { %p1456_p0 = pneg %p1455_p13 }
  0x2c   : > { %1330 = dma.hbm_to_vmem [thread:$0]  (!%p1767_p11), %s2026_s6, 2048, %s324_s25, [#allocation6], %s1646_s12, %s1646_s12, %s1647_s20  }
  0x2d   : > { %p1463_p3 = pnand %p1462_p5, %p1456_p0 }
  0x2f   : > { %1466 = shalt.err (!%p1463_p3)
}
  0x30   : > { %s2027_s7 = sld [smem:[#allocation22_spill]]  ;;  %s1478_s25 = scalar_lea.vmem %s350_s30, 2048 }
  0x31   : > { %p1479_p10 = scmp.ne.s32.totalorder %s350_s30, %s1478_s25  ;;  %p1486_p9 = scmp.lt.s32.totalorder %s350_s30, %s350_s30 }
  0x32   : > { %p1487_p13 = scmp.lt.s32.totalorder %s1478_s25, %s1478_s25 }
  0x33   : > { %p1481_p7 = pnand %p1479_p10, %p1417_p12 }
  0x34   : > { %p1488_p4 = por %p1487_p13, %p1486_p9 }
  0x35   : > { %p1482_p1 = pneg %p1481_p7 }
  0x36   : > { %1333 = dma.hbm_to_vmem [thread:$0]  (!%p1767_p11), %s2027_s7, 2048, %s337_s28, [#allocation9], %s1646_s12, %s1646_s12, %s1647_s20  }
  0x37   : > { %p1489_p2 = pnand %p1488_p4, %p1482_p1 }
  0x39   : > { %1492 = shalt.err (!%p1489_p2)
}
  0x3a   : > { %s2028_s8 = sld [smem:[#allocation23_spill]]  ;;  %s51_s22 = sadd.s32 1, %s1629_s15 }
  0x3b   : > { %s42_s28 = sadd.s32 1, %s1637_s17  ;;  %p58_p4 = scmp.ne.s32.totalorder %s1629_s15, %s1625_s14 }
  0x3c   : > { %p44_p6 = scmp.ge.s32.totalorder %s42_s28, 2  ;;  %p59_p12 = scmp.eq.s32.totalorder %s1641_s18, 0 }
  0x3d   : > { %p2029_p0 = scmp.eq.s32.totalorder %s1739_s19, 1  ;;  %p1351_p3 = scmp.lt.s32.totalorder %s1641_s18, 2 }
  0x3e   : > { %s2051_s28 = smov (%p44_p6, %s42_s28), 0  ;;  %p60_p10 = por %p59_p12, %p58_p4 }
  0x3f   : > { %p1804_p5 = por %p2029_p0, %p58_p4  ;;  %2031 = sst [smem:[#allocation19_spill]] %s2051_s28 }
  0x40   : > { %1336 = dma.hbm_to_vmem [thread:$0]  (!%p1767_p11), %s2028_s8, 2048, %s350_s30, [#allocation9], %s1646_s12, %s1646_s12, %s1647_s20  }
  0x41   : > { %s366_s29 = sand.u32 1, %s1629_s15   ;;  %s46_s11 = ssub.s32 %s1637_s17, %s2051_s28 }
  0x42   : > { %p49_p11 = scmp.eq.s32.totalorder %s46_s11, 0  ;;  %s1118_s30 = sshll.u32 %s366_s29, 3 }
  0x43   : > { %s1119_s12 = sshll.u32 %s1637_s17, 7  ;;  %s2032_s0 = sld [smem:[#allocation20_spill]] }
  0x44   : > { %s1816_s20 = scalar_select %p49_p11, %s1629_s15, %s51_s22  }
  0x45   : > { %s370_s6 = scalar_lea.vmem [#allocation2], %s1118_s30  ;;  %p1823_p7 = pnand %p1351_p3, %p60_p10 }
  0x46   : > { %s378_s7 = sshll.u32 %s370_s6, 4  ;;  %s1830_s11 = scalar_lea.hbm %s1999_s1, %s1119_s12  ;;  %s379_s7 = int_to_ptr.vmem [resolvable:$true] %s378_s7 }
  0x47   : > { %s385_s22 = sand.u32 1, %s1641_s18   ;;  %s367_s28 = scalar_lea.sflag [#allocation3], %s366_s29 }
  0x48   : > { %p1495_p1 = pneg %p1823_p7  ;;  %s1506_s25 = scalar_lea.vmem %s379_s7, 128 }
  0x49   : > { %s376_s27 = scalar_lea.hbm %s2032_s0, %s1119_s12  ;;  %p1507_p9 = scmp.ne.s32.totalorder %s379_s7, %s1506_s25 }
  0x4a   : > { %s1648_s6 = smov [#allocation2]  }
  0x4b   : > { %p1509_p13 = pnand %p1507_p9, %p1495_p1  ;;  %s1511_s24 = sshll.u32 %s1648_s6, 4  ;;  %s1512_s24 = int_to_ptr.vmem [resolvable:$false] %s1511_s24 }
  0x4c   : > { %s1513_s0 = scalar_lea.vmem %s1512_s24, 256  ;;  %p1514_p4 = scmp.lt.s32.totalorder %s379_s7, %s1512_s24 }
  0x4d   : > { %p1510_p2 = pneg %p1509_p13  ;;  %p1515_p6 = scmp.lt.s32.totalorder %s1513_s0, %s1506_s25 }
  0x4f   : > { %p1516_p12 = por %p1515_p6, %p1514_p4 }
  0x51   : > { %p1517_p0 = pnand %p1516_p12, %p1510_p2 }
  0x53   : > { %1520 = shalt.err (!%p1517_p0)
}
  0x54   : > { %1340 = dma.hbm_to_vmem [thread:$0]  (!%p1823_p7), %s376_s27, 128, %s379_s7, %s367_s28  }
  0x55   : > { %s389_s10 = scalar_lea.vmem [#allocation5], %s1118_s30  ;;  %s386_s29 = scalar_lea.sflag [#allocation6], %s385_s22 }
  0x56   : > { %s396_s13 = sshll.u32 %s389_s10, 4  ;;  %s1649_s6 = smov [#allocation5]   ;;  %s397_s13 = int_to_ptr.vmem [resolvable:$true] %s396_s13 }
  0x57   : > { %s1534_s12 = scalar_lea.vmem %s397_s13, 128  ;;  %s1539_s24 = sshll.u32 %s1649_s6, 4  ;;  %s1540_s24 = int_to_ptr.vmem [resolvable:$false] %s1539_s24 }
  0x58   : > { %p1535_p3 = scmp.ne.s32.totalorder %s397_s13, %s1534_s12  ;;  %s1541_s0 = scalar_lea.vmem %s1540_s24, 256 }
  0x59   : > { %p1542_p9 = scmp.lt.s32.totalorder %s397_s13, %s1540_s24  ;;  %p1543_p13 = scmp.lt.s32.totalorder %s1541_s0, %s1534_s12 }
  0x5a   : > { %p1537_p10 = pnand %p1535_p3, %p1495_p1 }
  0x5b   : > { %p1544_p2 = por %p1543_p13, %p1542_p9 }
  0x5c   : > { %p1538_p11 = pneg %p1537_p10 }
  0x5e   : > { %p1545_p4 = pnand %p1544_p2, %p1538_p11 }
  0x60   : > { %1548 = shalt.err (!%p1545_p4)
}
  0x61   : > { %1343 = dma.hbm_to_vmem [thread:$0]  (!%p1823_p7), %s1830_s11, 128, %s397_s13, %s386_s29  }
  0x62   : > { %411 = sbr.rel (%p1758_p8) target bundleno = 915 (0x393), region = 60  ;;  %s1849_s7 = sand.u32 (!%p1758_p8), 1, %s1625_s14  }
  0x63   : > { %s1852_s28 = sshll.u32 (!%p1758_p8), %s1849_s7, 3  ;;  %s414_s30 = scalar_lea.sflag (!%p1758_p8), [#allocation3], %s1849_s7 }
  0x64   : > { %s417_s27 = scalar_lea.vmem (!%p1758_p8), [#allocation2], %s1852_s28  ;;  %p2034_p1 = scmp.ne.s32.totalorder (!%p1758_p8), %s2021_s21, 0 }
  0x67   : > { %1600 = dma.done.wait (%p2034_p1), %s414_s30, 128  }
  0x68   : > { %1602 = vsyncadd (%p2034_p1), %s414_s30, 4294967168  ;;  %s422_s8 = sand.u32 1, %s1739_s19   ;;  %s426_s11 = scalar_lea.vmem [#allocation5], %s1852_s28 }
  0x69   : > { %s423_s23 = scalar_lea.sflag [#allocation6], %s422_s8 }
  0x6a   : > { %1604 = dma.done.wait (%p2034_p1), %s423_s23, 128  }
  0x6b   : > { %1606 = vsyncadd (%p2034_p1), %s423_s23, 4294967168  ;;  %p2035_p8 = scmp.eq.s32.totalorder %s1739_s19, 0 }
  0x6d   : > { %1608 = dma.done.wait (%p2035_p8), [#allocation6], 2048   ;;  %p2036_p7 = pmov %p2035_p8 }
  0x6f   : > { %1610 = vsyncadd (%p2036_p7), [#allocation6], 4294965248  ;;  %p2037_p6 = pmov %p2036_p7 }
  0x71   : > { %1612 = dma.done.wait (%p2037_p6), [#allocation9], 4096   ;;  %p2038_p12 = pmov %p2037_p6 }
  0x72   : > { %v1650_v0 = vmov 0.0   ;;  %vm1651_vm0 = vmmov 0   ;;  %v487_v1 = vld [vmem:[%s426_s11] sm:$0xff]  ;;  %v1880_v2 = vld [vmem:[%s417_s27] sm:$0xff]  ;;  %p483_p0 = scmp.lt.s32.totalorder %s1633_s16, 1  ;;  %v593_v9 = vlaneseq  ;;  %vm601_vm2 = vcmask 64512  }
  0x73   : > { %1614 = vsyncadd (%p2038_p12), [#allocation9], 4294963200  ;;  %1194 = vmatprep.subr.mxu0 %v1650_v0  ;;  %1196 = vmatprep.mubr.msk.f32.mxu0 %vm1651_vm0, %v1650_v0  ;;  %v1130_v3 = vld [vmem:[%s2002_s4] ss:$0 sm:$0xff]  ;;  %v717_v25 = vld [vmem:[#allocation8 + $0x78] sm:$0xff]  ;;  %s1136_s27 = sshll.u32 %s1633_s16, 7 }
  0x74   : > { %1204 = vmatprep.subr.mxu1 %v1650_v0  ;;  %1236 = vmatprep.mubr.msk.f32.mxu1 %vm1651_vm0, %v1650_v0  ;;  %v1129_v4 = vld [vmem:[%s2003_s5] ss:$0 sm:$0xff]  ;;  %s484_s29 = scalar_select %p483_p0, %s1633_s16, 1  ;;  %v594_v11 = vshrl.u32 %v593_v9, 7  ;;  %v598_v12 = vand.u32 127, %v593_v9  ;;  %v701_v26 = vld [vmem:[#allocation7 + $0x78] sm:$0xff] }
  0x75   : > { %1195 = vmatpush3.xpose.msra.mxu0 %v487_v1  ;;  %v1131_v5 = vld [vmem:[%s2001_s3] ss:$0 sm:$0xff]  ;;  %v498_v6 = vmul.f32 %v1129_v4, %v1880_v2  ;;  %v716_v27 = vld [vmem:[#allocation8 + $0x70] sm:$0xff]  ;;  %1205 = vmatpush3.msra.mxu1 %v717_v25  ;;  %v715_v29 = vld [vmem:[#allocation8 + $0x68] sm:$0xff]  ;;  %s482_s8 = scalar_lea.vmem [#allocation11], %s1852_s28  ;;  %s2039_s21 = sld [smem:[#allocation24_spill]] }
  0x76   : > { %v512_v7 = vmul.f32 %v1131_v5, %v1880_v2  ;;  %1199 = vmatprep.subr.mxu0 %v1650_v0  ;;  %s485_s24 = scalar_lea.vmem %s2000_s2, %s484_s29  ;;  %vm599_vm1 = vcmp.eq.s32.totalorder %v594_v11, %v598_v12  ;;  %v700_v28 = vld [vmem:[#allocation7 + $0x70] sm:$0xff]  ;;  %1206 = vmatprep.subr.mxu1 %v1650_v0  ;;  %v699_v30 = vld [vmem:[#allocation7 + $0x68] sm:$0xff]  ;;  %v714_v31 = vld [vmem:[#allocation8 + $0x60] sm:$0xff]  ;;  %s971_s23 = sshll.u32 %s482_s8, 4  ;;  %s972_s23 = int_to_ptr.vmem [resolvable:$true] %s971_s23 }
  0x77   : > { %v505_v8 = vadd.f32 %v1130_v3, %v498_v6  ;;  %v1132_v13 = vld [vmem:[%s485_s24] ss:$0 sm:$0xff]  ;;  %1207 = vmatpush3.msra.mxu1 %v716_v27  ;;  %v713_v33 = vld [vmem:[#allocation8 + $0x58] sm:$0xff]  ;;  %v712_v35 = vld [vmem:[#allocation8 + $0x50] sm:$0xff]  ;;  %s957_s25 = scalar_lea.sflag [#allocation4], %s1849_s7  ;;  %s1549_s10 = scalar_lea.vmem %s972_s23, 128 }
  0x78   : > { %513 = vadd.xlane.f32.xlu0 %v512_v7  ;;  %1208 = vmatprep.subr.mxu1 %v1650_v0  ;;  %v698_v32 = vld [vmem:[#allocation7 + $0x60] sm:$0xff]  ;;  %v697_v34 = vld [vmem:[#allocation7 + $0x58] sm:$0xff]  ;;  %v696_v36 = vld [vmem:[#allocation7 + $0x50] sm:$0xff]  ;;  %p1550_p3 = scmp.ne.s32.totalorder %s972_s23, %s1549_s10  ;;  %s1652_s13 = smov [#allocation11]  }
  0x79   : > { %1197 = vmatmul.mubr.f32.vlgmr.msra.gmra.mxu0 %v505_v8  ;;  %1209 = vmatpush3.msra.mxu1 %v715_v29  ;;  %v711_v37 = vld [vmem:[#allocation8 + $0x48] sm:$0xff]  ;;  %v710_v39 = vld [vmem:[#allocation8 + $0x40] sm:$0xff]  ;;  %v709_v41 = vld [vmem:[#allocation8 + $0x38] sm:$0xff]  ;;  %s1553_s29 = sshll.u32 %s1652_s13, 4  ;;  %s1554_s29 = int_to_ptr.vmem [resolvable:$false] %s1553_s29 }
  0x7a   : > { %1200 = vmatpush3.msra.mxu0 %v487_v1  ;;  %1201 = vmatprep.mubr.msk.f32.mxu0 %vm1651_vm0, %v1650_v0  ;;  %v695_v38 = vld [vmem:[#allocation7 + $0x48] sm:$0xff]  ;;  %v694_v40 = vld [vmem:[#allocation7 + $0x40] sm:$0xff]  ;;  %v693_v42 = vld [vmem:[#allocation7 + $0x38] sm:$0xff]  ;;  %p1551_p10 = pnand %p1550_p3, %p1804_p5  ;;  %s1555_s16 = scalar_lea.vmem %s1554_s29, 256 }
  0x7b   : > { %1239 = vmatprep.subr.mxu0 %v1650_v0  ;;  %1210 = vmatprep.subr.mxu1 %v1650_v0  ;;  %v708_v43 = vld [vmem:[#allocation8 + $0x30] sm:$0xff]  ;;  %v707_v45 = vld [vmem:[#allocation8 + $0x28] sm:$0xff]  ;;  %v706_v47 = vld [vmem:[#allocation8 + $0x20] sm:$0xff]  ;;  %s969_s22 = scalar_lea.hbm %s2039_s21, %s1136_s27  ;;  %p1556_p9 = scmp.lt.s32.totalorder %s972_s23, %s1554_s29 }
  0x7c   : > { %1211 = vmatpush3.msra.mxu1 %v714_v31  ;;  %v692_v44 = vld [vmem:[#allocation7 + $0x30] sm:$0xff]  ;;  %v691_v46 = vld [vmem:[#allocation7 + $0x28] sm:$0xff]  ;;  %v690_v48 = vld [vmem:[#allocation7 + $0x20] sm:$0xff]  ;;  %p1552_p11 = pneg %p1551_p10  ;;  %p1557_p13 = scmp.lt.s32.totalorder %s1555_s16, %s1549_s10 }
  0x7d   : > { %1212 = vmatprep.subr.mxu1 %v1650_v0  ;;  %v705_v49 = vld [vmem:[#allocation8 + $0x18] sm:$0xff]  ;;  %v704_v51 = vld [vmem:[#allocation8 + $0x10] sm:$0xff]  ;;  %v703_v53 = vld [vmem:[#allocation8 + $0x8] sm:$0xff] }
  0x7e   : > { %1213 = vmatpush3.msra.mxu1 %v713_v33  ;;  %v689_v50 = vld [vmem:[#allocation7 + $0x18] sm:$0xff]  ;;  %v688_v52 = vld [vmem:[#allocation7 + $0x10] sm:$0xff]  ;;  %v687_v54 = vld [vmem:[#allocation7 + $0x8] sm:$0xff]  ;;  %p1558_p2 = por %p1557_p13, %p1556_p9 }
  0x7f   : > { %1214 = vmatprep.subr.mxu1 %v1650_v0  ;;  %v702_v55 = vld [vmem:[#allocation8] sm:$0xff]  ;;  %v874_v61 = vld [vmem:[#allocation10 + $0x78] sm:$0xff]  ;;  %v873_v63 = vld [vmem:[#allocation10 + $0x70] sm:$0xff] }
  0x80   : > { %1215 = vmatpush3.msra.mxu1 %v712_v35  ;;  %v686_v56 = vld [vmem:[#allocation7] sm:$0xff]  ;;  %v872_v1 = vld [vmem:[#allocation10 + $0x68] sm:$0xff]  ;;  %v870_v4 = vld [vmem:[#allocation10 + $0x58] sm:$0xff]  ;;  %p1559_p4 = pnand %p1558_p2, %p1552_p11 }
  0x81   : > { %1216 = vmatprep.subr.mxu1 %v1650_v0  ;;  %v871_v3 = vld [vmem:[#allocation10 + $0x60] sm:$0xff]  ;;  %v869_v5 = vld [vmem:[#allocation10 + $0x50] sm:$0xff]  ;;  %v868_v6 = vld [vmem:[#allocation10 + $0x48] sm:$0xff] }
  0x82   : > { %1217 = vmatpush3.msra.mxu1 %v711_v37  ;;  %v867_v7 = vld [vmem:[#allocation10 + $0x40] sm:$0xff]  ;;  %v866_v8 = vld [vmem:[#allocation10 + $0x38] sm:$0xff]  ;;  %v865_v9 = vld [vmem:[#allocation10 + $0x30] sm:$0xff] }
  0x83   : > { %1218 = vmatprep.subr.mxu1 %v1650_v0  ;;  %v863_v11 = vld [vmem:[#allocation10 + $0x20] sm:$0xff]  ;;  %v862_v12 = vld [vmem:[#allocation10 + $0x18] sm:$0xff] }
  0x84   : > { %1219 = vmatpush3.msra.mxu1 %v710_v39 }
  0x85   : > { %1220 = vmatprep.subr.mxu1 %v1650_v0 }
  0x86   : > { %1221 = vmatpush3.msra.mxu1 %v709_v41 }
  0x87   : > { %1222 = vmatprep.subr.mxu1 %v1650_v0 }
  0x88   : > { %1223 = vmatpush3.msra.mxu1 %v708_v43 }
  0x89   : > { %1224 = vmatprep.subr.mxu1 %v1650_v0 }
  0x8a   : > { %1225 = vmatpush3.msra.mxu1 %v707_v45 }
  0x8b   : > { %1226 = vmatprep.subr.mxu1 %v1650_v0 }
  0x8c   : > { %1227 = vmatpush3.msra.mxu1 %v706_v47 }
  0x8d   : > { %1228 = vmatprep.subr.mxu1 %v1650_v0 }
  0x8e   : > { %1229 = vmatpush3.msra.mxu1 %v705_v49 }
  0x8f   : > { %1230 = vmatprep.subr.mxu1 %v1650_v0 }
  0x90   : > { %1231 = vmatpush3.msra.mxu1 %v704_v51 }
  0x91   : > { %1232 = vmatprep.subr.mxu1 %v1650_v0 }
  0x92   : > { %1233 = vmatpush3.msra.mxu1 %v703_v53 }
  0x93   : > { %1234 = vmatprep.subr.mxu1 %v1650_v0 }
  0x94   : > { %1235 = vmatpush3.msra.mxu1 %v702_v55 }
  0x95   : > { %1274 = vmatprep.subr.mxu1 %v1650_v0 }
 0x101   : > { %v514_v10 = vpop.xlane.xlu0 %513 }
 0x139   : > { %v581_v14 = vpop.f32.mrf.mxu0 }
 0x13a   : > { %v582_v15 = vadd.f32 %v581_v14, %v514_v10  ;;  %v864_v10 = vld [vmem:[#allocation10 + $0x28] sm:$0xff] }
 0x13b   : > { %v1198_v16 = vpop.f32.mrf.mxu0  ;;  %v860_v14 = vld [vmem:[#allocation10 + $0x8] sm:$0xff] }
 0x13c   : > { %v591_v17 = vadd.f32 %v1132_v13, %v582_v15  ;;  %v861_v13 = vld [vmem:[#allocation10 + $0x10] sm:$0xff]  ;;  %v859_v15 = vld [vmem:[#allocation10] sm:$0xff] }
 0x13e   : > { %v600_v18 = vsel %vm599_vm1, -1e+30, %v591_v17 }
 0x13f   : > { %v602_v19 = vsel %vm601_vm2, %v600_v18, -inf }
 0x140   : > { %603 = vmax.xlane.f32.xlu0 %v602_v19 }
 0x1c9   : > { %v604_v20 = vpop.xlane.xlu0 %603 }
 0x1ca   : > { %v605_v21 = vsub.f32 %v600_v18, %v604_v20 }
 0x1cc   : > { %v606_v22 = vmul.f32 1.442695, %v605_v21 }
 0x1ce   : > { %1411 = vpow2.f32 %v606_v22 }
 0x1db   : > { %v1412_v23 = vpop.eup %1411 }
 0x1dc   : > { %1202 = vmatmul.mubr.msk.f32.vlgmr.msra.gmra.mxu0 %vm601_vm2, %v1412_v23  ;;  %v608_v24 = vsel %vm601_vm2, %v1412_v23, 0.0  ;;  %v1134_v23 = vld [vmem:[%s2007_s9] ss:$0 sm:$0xff] }
 0x1dd   : > { %609 = vadd.xlane.f32.xlu1 %v608_v24  ;;  %1271 = vmatprep.mubr.msk.f32.mxu0 %vm1651_vm0, %v1650_v0 }
 0x1de   : > { %1240 = vmatpush3.msra.mxu0 %v701_v26 }
 0x1df   : > { %1241 = vmatprep.subr.mxu0 %v1650_v0 }
 0x1e0   : > { %1242 = vmatpush3.msra.mxu0 %v700_v28 }
 0x1e1   : > { %1243 = vmatprep.subr.mxu0 %v1650_v0 }
 0x1e2   : > { %1244 = vmatpush3.msra.mxu0 %v699_v30 }
 0x1e3   : > { %1245 = vmatprep.subr.mxu0 %v1650_v0 }
 0x1e4   : > { %1246 = vmatpush3.msra.mxu0 %v698_v32 }
 0x1e5   : > { %1247 = vmatprep.subr.mxu0 %v1650_v0 }
 0x1e6   : > { %1248 = vmatpush3.msra.mxu0 %v697_v34 }
 0x1e7   : > { %1249 = vmatprep.subr.mxu0 %v1650_v0 }
 0x1e8   : > { %1250 = vmatpush3.msra.mxu0 %v696_v36 }
 0x1e9   : > { %1251 = vmatprep.subr.mxu0 %v1650_v0 }
 0x1ea   : > { %1252 = vmatpush3.msra.mxu0 %v695_v38 }
 0x1eb   : > { %1253 = vmatprep.subr.mxu0 %v1650_v0 }
 0x1ec   : > { %1254 = vmatpush3.msra.mxu0 %v694_v40 }
 0x1ed   : > { %1255 = vmatprep.subr.mxu0 %v1650_v0 }
 0x1ee   : > { %1256 = vmatpush3.msra.mxu0 %v693_v42 }
 0x1ef   : > { %1257 = vmatprep.subr.mxu0 %v1650_v0 }
 0x1f0   : > { %1258 = vmatpush3.msra.mxu0 %v692_v44 }
 0x1f1   : > { %1259 = vmatprep.subr.mxu0 %v1650_v0 }
 0x1f2   : > { %1260 = vmatpush3.msra.mxu0 %v691_v46 }
 0x1f3   : > { %1261 = vmatprep.subr.mxu0 %v1650_v0 }
 0x1f4   : > { %1262 = vmatpush3.msra.mxu0 %v690_v48 }
 0x1f5   : > { %1263 = vmatprep.subr.mxu0 %v1650_v0 }
 0x1f6   : > { %1264 = vmatpush3.msra.mxu0 %v689_v50 }
 0x1f7   : > { %1265 = vmatprep.subr.mxu0 %v1650_v0 }
 0x1f8   : > { %1266 = vmatpush3.msra.mxu0 %v688_v52 }
 0x1f9   : > { %1267 = vmatprep.subr.mxu0 %v1650_v0 }
 0x1fa   : > { %1268 = vmatpush3.msra.mxu0 %v687_v54 }
 0x1fb   : > { %1269 = vmatprep.subr.mxu0 %v1650_v0 }
 0x1fc   : > { %1270 = vmatpush3.msra.mxu0 %v686_v56 }
 0x1fd   : > { %1272 = vmatmul.mubr.f32.vlgmr.msra.gmra.mxu0 %v1880_v2 }
 0x266   : > { %v610_v57 = vpop.xlane.xlu1 %609 }
 0x267   : > { %1413 = vrcp.f32 %v610_v57 }
 0x274   : > { %v1414_v58 = vpop.eup %1413 }
 0x29c   : > { %v680_v59 = vpop.f32.mrf.mxu0 }
 0x29d   : > { %v685_v60 = vmul.f32 %v1414_v58, %v680_v59 }
 0x29e   : > { %v1203_v62 = vpop.f32.mrf.mxu0 }
 0x29f   : > { %1237 = vmatmul.mubr.f32.vlgmr.msra.gmra.mxu1 %v685_v60  ;;  %v858_v16 = vmul.f32 %v685_v60, %v1880_v2 }
 0x2a0   : > { %1275 = vmatpush3.msra.mxu1 %v874_v61  ;;  %1306 = vmatprep.mubr.msk.f32.mxu1 %vm1651_vm0, %v1650_v0 }
 0x2a1   : > { %1276 = vmatprep.subr.mxu1 %v1650_v0 }
 0x2a2   : > { %1277 = vmatpush3.msra.mxu1 %v873_v63 }
 0x2a3   : > { %1278 = vmatprep.subr.mxu1 %v1650_v0 }
 0x2a4   : > { %1279 = vmatpush3.msra.mxu1 %v872_v1 }
 0x2a5   : > { %1280 = vmatprep.subr.mxu1 %v1650_v0 }
 0x2a6   : > { %1281 = vmatpush3.msra.mxu1 %v871_v3 }
 0x2a7   : > { %1282 = vmatprep.subr.mxu1 %v1650_v0 }
 0x2a8   : > { %1283 = vmatpush3.msra.mxu1 %v870_v4 }
 0x2a9   : > { %1284 = vmatprep.subr.mxu1 %v1650_v0 }
 0x2aa   : > { %1285 = vmatpush3.msra.mxu1 %v869_v5 }
 0x2ab   : > { %1286 = vmatprep.subr.mxu1 %v1650_v0 }
 0x2ac   : > { %1287 = vmatpush3.msra.mxu1 %v868_v6 }
 0x2ad   : > { %1288 = vmatprep.subr.mxu1 %v1650_v0 }
 0x2ae   : > { %1289 = vmatpush3.msra.mxu1 %v867_v7 }
 0x2af   : > { %1290 = vmatprep.subr.mxu1 %v1650_v0 }
 0x2b0   : > { %1291 = vmatpush3.msra.mxu1 %v866_v8 }
 0x2b1   : > { %1292 = vmatprep.subr.mxu1 %v1650_v0 }
 0x2b2   : > { %1293 = vmatpush3.msra.mxu1 %v865_v9 }
 0x2b3   : > { %1294 = vmatprep.subr.mxu1 %v1650_v0 }
 0x2b4   : > { %1295 = vmatpush3.msra.mxu1 %v864_v10 }
 0x2b5   : > { %1296 = vmatprep.subr.mxu1 %v1650_v0 }
 0x2b6   : > { %1297 = vmatpush3.msra.mxu1 %v863_v11 }
 0x2b7   : > { %1298 = vmatprep.subr.mxu1 %v1650_v0 }
 0x2b8   : > { %1299 = vmatpush3.msra.mxu1 %v862_v12 }
 0x2b9   : > { %1300 = vmatprep.subr.mxu1 %v1650_v0 }
 0x2ba   : > { %1301 = vmatpush3.msra.mxu1 %v861_v13 }
 0x2bb   : > { %1302 = vmatprep.subr.mxu1 %v1650_v0 }
 0x2bc   : > { %1303 = vmatpush3.msra.mxu1 %v860_v14 }
 0x2bd   : > { %1304 = vmatprep.subr.mxu1 %v1650_v0  ;;  %v854_v17 = vpop.f32.mrf.mxu0 }
 0x2be   : > { %1305 = vmatpush3.msra.mxu1 %v859_v15 }
 0x2bf   : > { %1307 = vmatmul.mubr.f32.vlgmr.msra.gmra.mxu1 %v858_v16  ;;  %v1273_v18 = vpop.f32.mrf.mxu0 }
 0x35f   : > { %v784_v19 = vpop.f32.mrf.mxu1 }
 0x360   : > { %v855_v21 = vadd.f32 %v854_v17, %v784_v19 }
 0x361   : > { %v1238_v20 = vpop.f32.mrf.mxu1 }
 0x37f   : > { %v941_v22 = vpop.f32.mrf.mxu1 }
 0x380   : > { %v945_v24 = vadd.f32 %v941_v22, %v855_v21 }
 0x381   : > { %v1308_v25 = vpop.f32.mrf.mxu1 }
 0x382   : > { %v953_v0 = vadd.f32 %v1134_v23, %v945_v24 }
 0x384   : > { %v954_v2 = vmax.f32 %v953_v0, 0.0 }
 0x386   : > { %955 = vst [vmem:[%s482_s8] sm:$0xff] %v954_v2 }
 0x387   : > { %1562 = shalt.err (!%p1559_p4)
}
 0x388   : > { %s1563_s28 = scalar_lea.hbm %s969_s22, 128  ;;  %s1567_s6 = scalar_lea.hbm %s2039_s21, 256 }
 0x389   : > { %p1564_p1 = scmp.ne.s32.totalorder %s969_s22, %s1563_s28  ;;  %p1568_p6 = scmp.lt.s32.totalorder %s969_s22, %s2039_s21 }
 0x38a   : > { %p1569_p12 = scmp.lt.s32.totalorder %s1567_s6, %s1563_s28 }
 0x38b   : > { %p1565_p8 = pnand %p1564_p1, %p1804_p5 }
 0x38c   : > { %p1570_p0 = por %p1569_p12, %p1568_p6 }
 0x38d   : > { %p1566_p7 = pneg %p1565_p8 }
 0x38f   : > { %p1571_p3 = pnand %p1570_p0, %p1566_p7 }
 0x391   : > { %1574 = shalt.err (!%p1571_p3)
}
 0x392   : > { %1325 = dma.vmem_to_hbm [thread:$0]  (%p1804_p5), %s972_s23, 128, %s969_s22, %s957_s25  }
 0x393 PF: > { %s2040_s30 = sld [smem:[#allocation17_spill]]  ;;  %p2043_p11 = scmp.ge.s32.totalorder %s1641_s18, 2 }
 0x394   : > { %s2041_s27 = sld [smem:[#allocation18_spill]] }
 0x399   : > { %s983_s8 = sand.u32 1, %s2040_s30  }
 0x39a   : > { %p2042_p10 = scmp.ne.s32.totalorder %s2041_s27, 0  ;;  %s984_s11 = scalar_lea.sflag [#allocation4], %s983_s8 }
 0x39c   : > { %p1345_p9 = pnand %p2043_p11, %p2042_p10 }
 0x39e   : > { %p1346_p13 = pneg %p1345_p9 }
 0x3a0   : > { %1616 = dma.done.wait (%p1346_p13), %s984_s11, 128  }
 0x3a1   : > { %1618 = vsyncadd (%p1346_p13), %s984_s11, 4294967168  ;;  %s30_s18 = sadd.s32 1, %s1641_s18   ;;  %s2044_s26 = sld [smem:[#allocation19_spill]] }
 0x3a2   : > { %p27_p2 = scmp.ge.s32.totalorder %s30_s18, 4   ;;  %s2045_s13 = smov %s1625_s14 }
 0x3a3   : > { %s2046_s14 = smov %s1629_s15  ;;  %s2047_s15 = smov %s1816_s20 }
 0x3a4   : > { %s2048_s16 = smov %s1637_s17  ;;  %29 = sbr.rel (!%p27_p2) target bundleno = 15 (0xf), region = 133 }
 0x3a7   : > { %s2049_s17 = smov %s2044_s26 }
 0x3a9   :  { %989 = vsyncpa [#allocation3], 1 }
 0x3aa   :  { %991 = vsyncpa [#allocation3 + $0x1], 1 }
 0x3ab   :  { %992 = vsyncpa [#allocation6], 1 }
 0x3ac   :  { %994 = vsyncpa [#allocation6 + $0x1], 1 }
 0x3ad   :  { %995 = vsyncpa [#allocation9], 1 }
 0x3ae   :  { %996 = vsyncpa [#allocation4], 1 }
 0x3af   :  { %998 = vsyncpa [#allocation4 + $0x1], 1 }

</bundles_post_ra>
